<compile_context>
chip_gen: v5e
topology: v5e:2x2
jax: 0.10.0
libtpu: 0.0.40
codegen_flags: <defaults>
</compile_context>

<pallas_src>
import functools

import jax
import jax.numpy as jnp
from jax import lax
from jax.experimental import pallas as pl
from jax.experimental.pallas import tpu as pltpu

LN_EPS = 1e-5
SEQ_ALIGN = 16          # bf16 min sublane tile
MAX_SEQ_TILE = 256      # matches the 256-wide MXU on v6e / v7x


def _layernorm(y, gamma, beta):
    """LayerNorm over the last dim, f32 math."""
    mu = jnp.mean(y, axis=-1, keepdims=True)
    var = jnp.mean((y - mu) ** 2, axis=-1, keepdims=True)
    return (y - mu) * lax.rsqrt(var + LN_EPS) * gamma + beta


def _round_up(x, m):
    return ((x + m - 1) // m) * m


# --------------------------------------------------------------------------- #
# Kernel 1: fused Q/K/V projection + LayerNorm (runs once per token).
# --------------------------------------------------------------------------- #
def _qkv_projection_kernel(x_ref, wq_ref, wk_ref, wv_ref, bq_ref, bk_ref,
                           bv_ref, gamma_ref, beta_ref, q_ref, k_ref, v_ref):
    x = x_ref[0]                       # (ts, D), native dtype -> MXU
    gamma = gamma_ref[...]             # (1, D) f32 (cast hoisted to the wrapper)
    beta = beta_ref[...]               # (1, D) f32

    def project(w_ref, b_ref):
        y = jnp.dot(x, w_ref[...], preferred_element_type=jnp.float32)
        return _layernorm(y + b_ref[...], gamma, beta)

    q_ref[0] = project(wq_ref, bq_ref).astype(q_ref.dtype)
    k_ref[0] = project(wk_ref, bk_ref).astype(k_ref.dtype)
    v_ref[0] = project(wv_ref, bv_ref).astype(v_ref.dtype)


# --------------------------------------------------------------------------- #
# Kernel 2: flash-attention (online softmax) over pre-projected q/k/v.
# --------------------------------------------------------------------------- #
def _flash_attention_kernel(q_ref, k_ref, v_ref, o_ref, m_scr, l_scr, acc_scr,
                            *, seq_len, block_k, mask_keys):
    ki = pl.program_id(2)

    @pl.when(ki == 0)
    def _init():
        m_scr[...] = jnp.full(m_scr.shape, -jnp.inf, jnp.float32)
        l_scr[...] = jnp.zeros(l_scr.shape, jnp.float32)
        acc_scr[...] = jnp.zeros(acc_scr.shape, jnp.float32)

    q = q_ref[0]                       # (tq, D)  attn_dtype (bf16 -> bf16 MXU path)
    k = k_ref[0]                       # (tk, D)
    v = v_ref[0]                       # (tk, D)

    # scores = q @ k^T: contract on the feature dim, no transpose, f32 accumulation.
    s = lax.dot_general(q, k, dimension_numbers=(((1,), (1,)), ((), ())),
                        preferred_element_type=jnp.float32)       # (tq, tk) f32

    if mask_keys:  # static Python flag: only emitted when S was padded
        col = ki * block_k + lax.broadcasted_iota(jnp.int32, s.shape, 1)
        s = jnp.where(col < seq_len, s, -jnp.inf)

    m_prev = m_scr[...]
    m_new = jnp.maximum(m_prev, jnp.max(s, axis=-1, keepdims=True))
    alpha = jnp.exp(m_prev - m_new)
    p = jnp.exp(s - m_new)                                        # f32
    l_scr[...] = alpha * l_scr[...] + jnp.sum(p, axis=-1, keepdims=True)
    acc_scr[...] = alpha * acc_scr[...] + jnp.dot(
        p.astype(v.dtype), v, preferred_element_type=jnp.float32)
    m_scr[...] = m_new

    # Finalize: normalize and store (dropout is identity in eval mode).
    @pl.when(ki == pl.num_programs(2) - 1)
    def _finalize():
        inv_l = pl.reciprocal(l_scr[...], approx=True)            # EUP vrcp, ~free
        o_ref[0] = (acc_scr[...] * inv_l).astype(o_ref.dtype)


def _seq_tiling(S, B, max_tile):
    """Pick (S_pad, tq, tk): padded sequence length and query/key tile sizes."""
    if S <= max_tile:
        S_pad = _round_up(S, SEQ_ALIGN)
        tq = tk = S_pad
        # v7x has 2 TensorCores; B and n_q are the "parallel" axes, so for B == 1 keep
        # n_q >= 2 when the sequence is long enough to split.
        if B == 1 and S_pad >= 2 * SEQ_ALIGN and (S_pad // 2) % SEQ_ALIGN == 0:
            tq = S_pad // 2
        return S_pad, tq, tk
    S_pad = _round_up(S, max_tile)
    return S_pad, max_tile, max_tile


@functools.partial(jax.jit, static_argnames=("attn_dtype", "max_seq_tile"))
def self_attention(x, wq, wk, wv, bq, bk, bv, gamma, beta,
                   attn_dtype=jnp.bfloat16, max_seq_tile=MAX_SEQ_TILE):
    """softmax(LN(xWq+bq) @ LN(xWk+bk)^T) @ LN(xWv+bv); weights stored (D_in, D_out)."""
    B, S, D = x.shape
    S_pad, tq, tk = _seq_tiling(S, B, max_seq_tile)
    n_q, n_kv = S_pad // tq, S_pad // tk
    n_s = S_pad // tk

    if S_pad != S:
        x = jnp.pad(x, ((0, 0), (0, S_pad - S), (0, 0)))

    # Hoist dtype / shape plumbing out of the kernels.
    f32 = jnp.float32
    bq = bq.reshape(1, D).astype(f32)
    bk = bk.reshape(1, D).astype(f32)
    bv = bv.reshape(1, D).astype(f32)
    gamma = gamma.reshape(1, D).astype(f32)
    beta = beta.reshape(1, D).astype(f32)

    const = lambda b, si: (0, 0)
    row_spec = pl.BlockSpec((1, tk, D), lambda b, si: (b, si, 0))

    # TODO(synk): for large D (>~1k) pass bf16 weights and set
    # CompilerParams(vmem_limit_bytes=...); on v7x (64 MiB VMEM) double-buffered f32
    # (D, D) weight blocks dominate the budget otherwise.
    q, k, v = pl.pallas_call(
        _qkv_projection_kernel,
        out_shape=tuple(jax.ShapeDtypeStruct((B, S_pad, D), attn_dtype)
                        for _ in range(3)),
        grid_spec=pltpu.PrefetchScalarGridSpec(
            num_scalar_prefetch=0,
            grid=(B, n_s),
            in_specs=[
                row_spec,                               # x
                pl.BlockSpec((D, D), const),            # Wq
                pl.BlockSpec((D, D), const),            # Wk
                pl.BlockSpec((D, D), const),            # Wv
                pl.BlockSpec((1, D), const),            # bq
                pl.BlockSpec((1, D), const),            # bk
                pl.BlockSpec((1, D), const),            # bv
                pl.BlockSpec((1, D), const),            # gamma
                pl.BlockSpec((1, D), const),            # beta
            ],
            out_specs=(row_spec, row_spec, row_spec),
        ),
        compiler_params=pltpu.CompilerParams(
            dimension_semantics=("parallel", "parallel")),
    )(x, wq, wk, wv, bq, bk, bv, gamma, beta)

    # Flash attention over the pre-projected q/k/v.  If DMA latency for k/v shows up
    # exposed on v5e, bump those BlockSpecs to pipeline_mode=pl.Buffered(3).
    kernel = functools.partial(_flash_attention_kernel, seq_len=S, block_k=tk,
                               mask_keys=(S_pad != S))
    out = pl.pallas_call(
        kernel,
        out_shape=jax.ShapeDtypeStruct((B, S_pad, D), x.dtype),
        grid_spec=pltpu.PrefetchScalarGridSpec(
            num_scalar_prefetch=0,
            grid=(B, n_q, n_kv),
            in_specs=[
                pl.BlockSpec((1, tq, D), lambda b, qi, ki: (b, qi, 0)),   # q
                pl.BlockSpec((1, tk, D), lambda b, qi, ki: (b, ki, 0)),   # k
                pl.BlockSpec((1, tk, D), lambda b, qi, ki: (b, ki, 0)),   # v
            ],
            out_specs=pl.BlockSpec((1, tq, D), lambda b, qi, ki: (b, qi, 0)),
            scratch_shapes=[
                pltpu.VMEM((tq, 1), jnp.float32),       # running max  m
                pltpu.VMEM((tq, 1), jnp.float32),       # running sum  l
                pltpu.VMEM((tq, D), jnp.float32),       # output accumulator
            ],
        ),
        compiler_params=pltpu.CompilerParams(
            dimension_semantics=("parallel", "parallel", "arbitrary")),
    )(q, k, v)

    return out[:, :S, :] if S_pad != S else out


def reference_jax(x, wq, wk, wv, bq, bk, bv, gamma, beta,
                  attn_dtype=jnp.float32):
    """Pure-JAX reference; attn_dtype=bf16 mirrors the kernel's MXU operand dtype."""
    xf = x.astype(jnp.float32)
    q = _layernorm(xf @ wq + bq, gamma, beta).astype(attn_dtype)
    k = _layernorm(xf @ wk + bk, gamma, beta).astype(attn_dtype)
    v = _layernorm(xf @ wv + bv, gamma, beta).astype(attn_dtype)
    s = jnp.einsum("bqd,bkd->bqk", q, k, preferred_element_type=jnp.float32)
    att = jax.nn.softmax(s, axis=-1)
    out = jnp.einsum("bqk,bkd->bqd", att.astype(attn_dtype), v,
                     preferred_element_type=jnp.float32)
    return out.astype(x.dtype)


if __name__ == "__main__":
    B, S, D = 2, 8, 32  # batch, seq, input_dim

    key = jax.random.PRNGKey(0)
    kx, kq, kk, kv, kbq, kbk, kbv = jax.random.split(key, 7)

    x = jax.random.normal(kx, (B, S, D), dtype=jnp.float32)

    scale = 1.0 / jnp.sqrt(D)
    wq = jax.random.uniform(kq, (D, D), jnp.float32, -scale, scale)
    wk = jax.random.uniform(kk, (D, D), jnp.float32, -scale, scale)
    wv = jax.random.uniform(kv, (D, D), jnp.float32, -scale, scale)
    bq = jax.random.uniform(kbq, (1, D), jnp.float32, -scale, scale)
    bk = jax.random.uniform(kbk, (1, D), jnp.float32, -scale, scale)
    bv = jax.random.uniform(kbv, (1, D), jnp.float32, -scale, scale)
    gamma = jnp.ones((1, D), jnp.float32)
    beta = jnp.zeros((1, D), jnp.float32)

    args = (x, wq, wk, wv, bq, bk, bv, gamma, beta)

    # Default path: bf16 MXU operands for the attention matmuls.
    out = jax.block_until_ready(self_attention(*args))
    # f32 path (attention operands kept f32) for a tight structural check.
    out_f32 = jax.block_until_ready(self_attention(*args, attn_dtype=jnp.float32))

    ref = reference_jax(*args)                                  # exact f32 reference
    ref_bf16 = reference_jax(*args, attn_dtype=jnp.bfloat16)    # numerics-matched

    assert out.shape == (B, S, D) and out_f32.shape == (B, S, D)
    # f32 kernel vs f32 reference: only approx-reciprocal / accumulation-order slack.
    assert jnp.allclose(out_f32, ref, atol=5e-3, rtol=5e-3), "f32 path mismatch"
    # bf16 kernel vs a reference that quantizes q/k/v/att the same way: tight.
    assert jnp.allclose(out, ref_bf16, atol=1e-2, rtol=1e-2), "bf16 path mismatch"
    # bf16 kernel vs exact f32 reference: loose, bounded by bf16 operand rounding.
    assert jnp.allclose(out, ref, atol=1e-1, rtol=1e-1), "bf16 sanity check failed"

    print("KERNEL_OK")
</pallas_src>

<mosaic_0001>
module attributes {stable_mosaic.version = 11 : i64} {
  func.func @_flash_attention_kernel(%arg0: i32, %arg1: i32, %arg2: i32, %arg3: memref<1x16x32xbf16, #tpu.memory_space<vmem>>, %arg4: memref<1x16x32xbf16, #tpu.memory_space<vmem>>, %arg5: memref<1x16x32xbf16, #tpu.memory_space<vmem>>, %arg6: memref<1x16x32xf32, #tpu.memory_space<vmem>>, %arg7: memref<16x1xf32, #tpu.memory_space<vmem>>, %arg8: memref<16x1xf32, #tpu.memory_space<vmem>>, %arg9: memref<16x32xf32, #tpu.memory_space<vmem>>) attributes {dimension_semantics = [#tpu.dimension_semantics<parallel>, #tpu.dimension_semantics<parallel>, #tpu.dimension_semantics<arbitrary>], iteration_bounds = array<i64: 2, 1, 1>, scalar_prefetch = 0 : i64, scratch_operands = 3 : i64, tpu.core_type = #tpu.core_type<tc>, window_params = [{transform_indices = @transform_0, window_bounds = array<i64: 1, 16, 32>}, {transform_indices = @transform_1, window_bounds = array<i64: 1, 16, 32>}, {transform_indices = @transform_2, window_bounds = array<i64: 1, 16, 32>}, {transform_indices = @transform_3, window_bounds = array<i64: 1, 16, 32>}]} {
    %c0_i32 = arith.constant 0 : i32
    %0 = arith.cmpi eq, %arg2, %c0_i32 : i32
    %1 = arith.extui %0 : i1 to i32
    %c0_i32_0 = arith.constant 0 : i32
    %2 = arith.cmpi ne, %1, %c0_i32_0 : i32
    scf.if %2 {
      %cst_27 = arith.constant 0xFF800000 : f32
      %44 = vector.broadcast %cst_27 : f32 to vector<16x1xf32>
      %c0_28 = arith.constant 0 : index
      %c0_29 = arith.constant 0 : index
      %45 = vector.load %arg7[%c0_28, %c0_29] : memref<16x1xf32, #tpu.memory_space<vmem>>, vector<16x1xf32>
      tpu.vector_store %arg7[%c0_28, %c0_29], %44 {strides = array<i32>} : memref<16x1xf32, #tpu.memory_space<vmem>>, vector<16x1xf32>,
      %cst_30 = arith.constant 0.000000e+00 : f32
      %46 = vector.broadcast %cst_30 : f32 to vector<16x1xf32>
      %c0_31 = arith.constant 0 : index
      %c0_32 = arith.constant 0 : index
      %47 = vector.load %arg8[%c0_31, %c0_32] : memref<16x1xf32, #tpu.memory_space<vmem>>, vector<16x1xf32>
      tpu.vector_store %arg8[%c0_31, %c0_32], %46 {strides = array<i32>} : memref<16x1xf32, #tpu.memory_space<vmem>>, vector<16x1xf32>,
      %cst_33 = arith.constant 0.000000e+00 : f32
      %48 = vector.broadcast %cst_33 : f32 to vector<16x32xf32>
      %c0_34 = arith.constant 0 : index
      %c0_35 = arith.constant 0 : index
      %49 = vector.load %arg9[%c0_34, %c0_35] : memref<16x32xf32, #tpu.memory_space<vmem>>, vector<16x32xf32>
      tpu.vector_store %arg9[%c0_34, %c0_35], %48 {strides = array<i32>} : memref<16x32xf32, #tpu.memory_space<vmem>>, vector<16x32xf32>,
    } else {
    }
    %c0 = arith.constant 0 : index
    %c0_1 = arith.constant 0 : index
    %c0_2 = arith.constant 0 : index
    %3 = vector.load %arg3[%c0, %c0_1, %c0_2] : memref<1x16x32xbf16, #tpu.memory_space<vmem>>, vector<1x16x32xbf16>
    %4 = vector.shape_cast %3 : vector<1x16x32xbf16> to vector<16x32xbf16>
    %c0_3 = arith.constant 0 : index
    %c0_4 = arith.constant 0 : index
    %c0_5 = arith.constant 0 : index
    %5 = vector.load %arg4[%c0_3, %c0_4, %c0_5] : memref<1x16x32xbf16, #tpu.memory_space<vmem>>, vector<1x16x32xbf16>
    %6 = vector.shape_cast %5 : vector<1x16x32xbf16> to vector<16x32xbf16>
    %c0_6 = arith.constant 0 : index
    %c0_7 = arith.constant 0 : index
    %c0_8 = arith.constant 0 : index
    %7 = vector.load %arg5[%c0_6, %c0_7, %c0_8] : memref<1x16x32xbf16, #tpu.memory_space<vmem>>, vector<1x16x32xbf16>
    %8 = vector.shape_cast %7 : vector<1x16x32xbf16> to vector<16x32xbf16>
    %cst = arith.constant dense<0.000000e+00> : vector<16x16xf32>
    %9 = tpu.matmul %4, %6, %cst {dimension_numbers = #tpu.dot_dimension_numbers<[1], [1], [0], [0], [0, 0, 1, 0], [], []>} : vector<16x32xbf16>, vector<16x32xbf16>, vector<16x16xf32> -> vector<16x16xf32>
    %c16_i32 = arith.constant 16 : i32
    %10 = arith.muli %arg2, %c16_i32 : i32
    %11 = tpu.iota {dimensions = array<i32: 1>} : vector<16x16xi32>
    %12 = vector.broadcast %10 : i32 to vector<16x16xi32>
    %13 = arith.addi %12, %11 : vector<16x16xi32>
    %c8_i32 = arith.constant 8 : i32
    %14 = vector.broadcast %c8_i32 : i32 to vector<16x16xi32>
    %15 = arith.cmpi slt, %13, %14 : vector<16x16xi32>
    %cst_9 = arith.constant 0xFF800000 : f32
    %16 = vector.broadcast %cst_9 : f32 to vector<16x16xf32>
    %17 = arith.select %15, %9, %16 : vector<16x16xi1>, vector<16x16xf32>
    %c0_10 = arith.constant 0 : index
    %c0_11 = arith.constant 0 : index
    %18 = vector.load %arg7[%c0_10, %c0_11] : memref<16x1xf32, #tpu.memory_space<vmem>>, vector<16x1xf32>
    %cst_12 = arith.constant dense<0xFF800000> : vector<16xf32>
    %19 = vector.multi_reduction <maximumf>, %17, %cst_12 [1] : vector<16x16xf32> to vector<16xf32>
    %20 = vector.shape_cast %19 : vector<16xf32> to vector<16x1xf32>
    %21 = arith.maximumf %18, %20 : vector<16x1xf32>
    %22 = arith.subf %18, %21 : vector<16x1xf32>
    %23 = math.exp %22 : vector<16x1xf32>
    %24 = vector.broadcast %21 : vector<16x1xf32> to vector<16x16xf32>
    %25 = arith.subf %17, %24 : vector<16x16xf32>
    %26 = math.exp %25 : vector<16x16xf32>
    %c0_13 = arith.constant 0 : index
    %c0_14 = arith.constant 0 : index
    %27 = vector.load %arg8[%c0_13, %c0_14] : memref<16x1xf32, #tpu.memory_space<vmem>>, vector<16x1xf32>
    %28 = arith.mulf %23, %27 : vector<16x1xf32>
    %cst_15 = arith.constant dense<0.000000e+00> : vector<16xf32>
    %29 = vector.multi_reduction <add>, %26, %cst_15 [1] : vector<16x16xf32> to vector<16xf32>
    %30 = vector.shape_cast %29 : vector<16xf32> to vector<16x1xf32>
    %31 = arith.addf %28, %30 : vector<16x1xf32>
    %c0_16 = arith.constant 0 : index
    %c0_17 = arith.constant 0 : index
    %32 = vector.load %arg8[%c0_16, %c0_17] : memref<16x1xf32, #tpu.memory_space<vmem>>, vector<16x1xf32>
    tpu.vector_store %arg8[%c0_16, %c0_17], %31 {strides = array<i32>} : memref<16x1xf32, #tpu.memory_space<vmem>>, vector<16x1xf32>,
    %c0_18 = arith.constant 0 : index
    %c0_19 = arith.constant 0 : index
    %33 = vector.load %arg9[%c0_18, %c0_19] : memref<16x32xf32, #tpu.memory_space<vmem>>, vector<16x32xf32>
    %34 = vector.broadcast %23 : vector<16x1xf32> to vector<16x32xf32>
    %35 = arith.mulf %34, %33 : vector<16x32xf32>
    %36 = arith.truncf %26 : vector<16x16xf32> to vector<16x16xbf16>
    %cst_20 = arith.constant dense<0.000000e+00> : vector<16x32xf32>
    %37 = tpu.matmul %36, %8, %cst_20 {dimension_numbers = #tpu.dot_dimension_numbers<[1], [0], [0], [1], [0, 0, 1, 1], [], []>} : vector<16x16xbf16>, vector<16x32xbf16>, vector<16x32xf32> -> vector<16x32xf32>
    %38 = arith.addf %35, %37 : vector<16x32xf32>
    %c0_21 = arith.constant 0 : index
    %c0_22 = arith.constant 0 : index
    %39 = vector.load %arg9[%c0_21, %c0_22] : memref<16x32xf32, #tpu.memory_space<vmem>>, vector<16x32xf32>
    tpu.vector_store %arg9[%c0_21, %c0_22], %38 {strides = array<i32>} : memref<16x32xf32, #tpu.memory_space<vmem>>, vector<16x32xf32>,
    %c0_23 = arith.constant 0 : index
    %c0_24 = arith.constant 0 : index
    %40 = vector.load %arg7[%c0_23, %c0_24] : memref<16x1xf32, #tpu.memory_space<vmem>>, vector<16x1xf32>
    tpu.vector_store %arg7[%c0_23, %c0_24], %21 {strides = array<i32>} : memref<16x1xf32, #tpu.memory_space<vmem>>, vector<16x1xf32>,
    %c0_i32_25 = arith.constant 0 : i32
    %41 = arith.cmpi eq, %arg2, %c0_i32_25 : i32
    %42 = arith.extui %41 : i1 to i32
    %c0_i32_26 = arith.constant 0 : i32
    %43 = arith.cmpi ne, %42, %c0_i32_26 : i32
    scf.if %43 {
      %c0_27 = arith.constant 0 : index
      %c0_28 = arith.constant 0 : index
      %44 = vector.load %arg8[%c0_27, %c0_28] : memref<16x1xf32, #tpu.memory_space<vmem>>, vector<16x1xf32>
      %45 = tpu.reciprocal %44 {approx = true} : vector<16x1xf32> -> vector<16x1xf32>
      %c0_29 = arith.constant 0 : index
      %c0_30 = arith.constant 0 : index
      %46 = vector.load %arg9[%c0_29, %c0_30] : memref<16x32xf32, #tpu.memory_space<vmem>>, vector<16x32xf32>
      %47 = vector.broadcast %45 : vector<16x1xf32> to vector<16x32xf32>
      %48 = arith.mulf %46, %47 : vector<16x32xf32>
      %c0_31 = arith.constant 0 : index
      %c0_32 = arith.constant 0 : index
      %c0_33 = arith.constant 0 : index
      %49 = vector.load %arg6[%c0_31, %c0_32, %c0_33] : memref<1x16x32xf32, #tpu.memory_space<vmem>>, vector<1x16x32xf32>
      %50 = vector.shape_cast %49 : vector<1x16x32xf32> to vector<16x32xf32>
      %51 = vector.shape_cast %48 : vector<16x32xf32> to vector<1x16x32xf32>
      tpu.vector_store %arg6[%c0_31, %c0_32, %c0_33], %51 {strides = array<i32>} : memref<1x16x32xf32, #tpu.memory_space<vmem>>, vector<1x16x32xf32>,
    } else {
    }
    return
  }
  func.func @transform_0(%arg0: i32, %arg1: i32, %arg2: i32) -> (i32, i32, i32) {
    %c0_i32 = arith.constant 0 : i32
    %c0_i32_0 = arith.constant 0 : i32
    return %arg0, %arg1, %c0_i32 : i32, i32, i32
  }
  func.func @transform_1(%arg0: i32, %arg1: i32, %arg2: i32) -> (i32, i32, i32) {
    %c0_i32 = arith.constant 0 : i32
    %c0_i32_0 = arith.constant 0 : i32
    return %arg0, %arg2, %c0_i32 : i32, i32, i32
  }
  func.func @transform_2(%arg0: i32, %arg1: i32, %arg2: i32) -> (i32, i32, i32) {
    %c0_i32 = arith.constant 0 : i32
    %c0_i32_0 = arith.constant 0 : i32
    return %arg0, %arg2, %c0_i32 : i32, i32, i32
  }
  func.func @transform_3(%arg0: i32, %arg1: i32, %arg2: i32) -> (i32, i32, i32) {
    %c0_i32 = arith.constant 0 : i32
    %c0_i32_0 = arith.constant 0 : i32
    return %arg0, %arg1, %c0_i32 : i32, i32, i32
  }
}

module attributes {stable_mosaic.version = 11 : i64} {
  func.func @_qkv_projection_kernel(%arg0: i32, %arg1: i32, %arg2: memref<1x16x32xf32, #tpu.memory_space<vmem>>, %arg3: memref<32x32xf32, #tpu.memory_space<vmem>>, %arg4: memref<32x32xf32, #tpu.memory_space<vmem>>, %arg5: memref<32x32xf32, #tpu.memory_space<vmem>>, %arg6: memref<1x32xf32, #tpu.memory_space<vmem>>, %arg7: memref<1x32xf32, #tpu.memory_space<vmem>>, %arg8: memref<1x32xf32, #tpu.memory_space<vmem>>, %arg9: memref<1x32xf32, #tpu.memory_space<vmem>>, %arg10: memref<1x32xf32, #tpu.memory_space<vmem>>, %arg11: memref<1x16x32xbf16, #tpu.memory_space<vmem>>, %arg12: memref<1x16x32xbf16, #tpu.memory_space<vmem>>, %arg13: memref<1x16x32xbf16, #tpu.memory_space<vmem>>) attributes {dimension_semantics = [#tpu.dimension_semantics<parallel>, #tpu.dimension_semantics<parallel>], iteration_bounds = array<i64: 2, 1>, scalar_prefetch = 0 : i64, scratch_operands = 0 : i64, tpu.core_type = #tpu.core_type<tc>, window_params = [{transform_indices = @transform_0, window_bounds = array<i64: 1, 16, 32>}, {pipeline_mode = #tpu.pipeline_mode<synchronous>, transform_indices = @transform_1, window_bounds = array<i64: 32, 32>}, {pipeline_mode = #tpu.pipeline_mode<synchronous>, transform_indices = @transform_2, window_bounds = array<i64: 32, 32>}, {pipeline_mode = #tpu.pipeline_mode<synchronous>, transform_indices = @transform_3, window_bounds = array<i64: 32, 32>}, {pipeline_mode = #tpu.pipeline_mode<synchronous>, transform_indices = @transform_4, window_bounds = array<i64: 1, 32>}, {pipeline_mode = #tpu.pipeline_mode<synchronous>, transform_indices = @transform_5, window_bounds = array<i64: 1, 32>}, {pipeline_mode = #tpu.pipeline_mode<synchronous>, transform_indices = @transform_6, window_bounds = array<i64: 1, 32>}, {pipeline_mode = #tpu.pipeline_mode<synchronous>, transform_indices = @transform_7, window_bounds = array<i64: 1, 32>}, {pipeline_mode = #tpu.pipeline_mode<synchronous>, transform_indices = @transform_8, window_bounds = array<i64: 1, 32>}, {transform_indices = @transform_9, window_bounds = array<i64: 1, 16, 32>}, {transform_indices = @transform_10, window_bounds = array<i64: 1, 16, 32>}, {transform_indices = @transform_11, window_bounds = array<i64: 1, 16, 32>}]} {
    %c0 = arith.constant 0 : index
    %c0_0 = arith.constant 0 : index
    %c0_1 = arith.constant 0 : index
    %0 = vector.load %arg2[%c0, %c0_0, %c0_1] : memref<1x16x32xf32, #tpu.memory_space<vmem>>, vector<1x16x32xf32>
    %1 = vector.shape_cast %0 : vector<1x16x32xf32> to vector<16x32xf32>
    %c0_2 = arith.constant 0 : index
    %c0_3 = arith.constant 0 : index
    %2 = vector.load %arg9[%c0_2, %c0_3] : memref<1x32xf32, #tpu.memory_space<vmem>>, vector<1x32xf32>
    %c0_4 = arith.constant 0 : index
    %c0_5 = arith.constant 0 : index
    %3 = vector.load %arg10[%c0_4, %c0_5] : memref<1x32xf32, #tpu.memory_space<vmem>>, vector<1x32xf32>
    %c0_6 = arith.constant 0 : index
    %c0_7 = arith.constant 0 : index
    %4 = vector.load %arg3[%c0_6, %c0_7] : memref<32x32xf32, #tpu.memory_space<vmem>>, vector<32x32xf32>
    %cst = arith.constant dense<0.000000e+00> : vector<16x32xf32>
    %5 = tpu.matmul %1, %4, %cst {dimension_numbers = #tpu.dot_dimension_numbers<[1], [0], [0], [1], [0, 0, 1, 1], [], []>} : vector<16x32xf32>, vector<32x32xf32>, vector<16x32xf32> -> vector<16x32xf32>
    %c0_8 = arith.constant 0 : index
    %c0_9 = arith.constant 0 : index
    %6 = vector.load %arg6[%c0_8, %c0_9] : memref<1x32xf32, #tpu.memory_space<vmem>>, vector<1x32xf32>
    %7 = vector.broadcast %6 : vector<1x32xf32> to vector<16x32xf32>
    %8 = arith.addf %5, %7 : vector<16x32xf32>
    %cst_10 = arith.constant dense<0.000000e+00> : vector<16xf32>
    %9 = vector.multi_reduction <add>, %8, %cst_10 [1] : vector<16x32xf32> to vector<16xf32>
    %10 = vector.shape_cast %9 : vector<16xf32> to vector<16x1xf32>
    %cst_11 = arith.constant 3.200000e+01 : f32
    %11 = vector.broadcast %cst_11 : f32 to vector<16x1xf32>
    %12 = arith.divf %10, %11 : vector<16x1xf32>
    %13 = vector.broadcast %12 : vector<16x1xf32> to vector<16x32xf32>
    %14 = arith.subf %8, %13 : vector<16x32xf32>
    %15 = arith.mulf %14, %14 : vector<16x32xf32>
    %cst_12 = arith.constant dense<0.000000e+00> : vector<16xf32>
    %16 = vector.multi_reduction <add>, %15, %cst_12 [1] : vector<16x32xf32> to vector<16xf32>
    %17 = vector.shape_cast %16 : vector<16xf32> to vector<16x1xf32>
    %cst_13 = arith.constant 3.200000e+01 : f32
    %18 = vector.broadcast %cst_13 : f32 to vector<16x1xf32>
    %19 = arith.divf %17, %18 : vector<16x1xf32>
    %20 = vector.broadcast %12 : vector<16x1xf32> to vector<16x32xf32>
    %21 = arith.subf %8, %20 : vector<16x32xf32>
    %cst_14 = arith.constant 9.99999974E-6 : f32
    %22 = vector.broadcast %cst_14 : f32 to vector<16x1xf32>
    %23 = arith.addf %19, %22 : vector<16x1xf32>
    %24 = math.rsqrt %23 : vector<16x1xf32>
    %25 = vector.broadcast %24 : vector<16x1xf32> to vector<16x32xf32>
    %26 = arith.mulf %21, %25 : vector<16x32xf32>
    %27 = vector.broadcast %2 : vector<1x32xf32> to vector<16x32xf32>
    %28 = arith.mulf %26, %27 : vector<16x32xf32>
    %29 = vector.broadcast %3 : vector<1x32xf32> to vector<16x32xf32>
    %30 = arith.addf %28, %29 : vector<16x32xf32>
    %31 = arith.truncf %30 : vector<16x32xf32> to vector<16x32xbf16>
    %c0_15 = arith.constant 0 : index
    %c0_16 = arith.constant 0 : index
    %c0_17 = arith.constant 0 : index
    %32 = vector.load %arg11[%c0_15, %c0_16, %c0_17] : memref<1x16x32xbf16, #tpu.memory_space<vmem>>, vector<1x16x32xbf16>
    %33 = vector.shape_cast %32 : vector<1x16x32xbf16> to vector<16x32xbf16>
    %34 = vector.shape_cast %31 : vector<16x32xbf16> to vector<1x16x32xbf16>
    tpu.vector_store %arg11[%c0_15, %c0_16, %c0_17], %34 {strides = array<i32>} : memref<1x16x32xbf16, #tpu.memory_space<vmem>>, vector<1x16x32xbf16>,
    %c0_18 = arith.constant 0 : index
    %c0_19 = arith.constant 0 : index
    %35 = vector.load %arg4[%c0_18, %c0_19] : memref<32x32xf32, #tpu.memory_space<vmem>>, vector<32x32xf32>
    %cst_20 = arith.constant dense<0.000000e+00> : vector<16x32xf32>
    %36 = tpu.matmul %1, %35, %cst_20 {dimension_numbers = #tpu.dot_dimension_numbers<[1], [0], [0], [1], [0, 0, 1, 1], [], []>} : vector<16x32xf32>, vector<32x32xf32>, vector<16x32xf32> -> vector<16x32xf32>
    %c0_21 = arith.constant 0 : index
    %c0_22 = arith.constant 0 : index
    %37 = vector.load %arg7[%c0_21, %c0_22] : memref<1x32xf32, #tpu.memory_space<vmem>>, vector<1x32xf32>
    %38 = vector.broadcast %37 : vector<1x32xf32> to vector<16x32xf32>
    %39 = arith.addf %36, %38 : vector<16x32xf32>
    %cst_23 = arith.constant dense<0.000000e+00> : vector<16xf32>
    %40 = vector.multi_reduction <add>, %39, %cst_23 [1] : vector<16x32xf32> to vector<16xf32>
    %41 = vector.shape_cast %40 : vector<16xf32> to vector<16x1xf32>
    %cst_24 = arith.constant 3.200000e+01 : f32
    %42 = vector.broadcast %cst_24 : f32 to vector<16x1xf32>
    %43 = arith.divf %41, %42 : vector<16x1xf32>
    %44 = vector.broadcast %43 : vector<16x1xf32> to vector<16x32xf32>
    %45 = arith.subf %39, %44 : vector<16x32xf32>
    %46 = arith.mulf %45, %45 : vector<16x32xf32>
    %cst_25 = arith.constant dense<0.000000e+00> : vector<16xf32>
    %47 = vector.multi_reduction <add>, %46, %cst_25 [1] : vector<16x32xf32> to vector<16xf32>
    %48 = vector.shape_cast %47 : vector<16xf32> to vector<16x1xf32>
    %cst_26 = arith.constant 3.200000e+01 : f32
    %49 = vector.broadcast %cst_26 : f32 to vector<16x1xf32>
    %50 = arith.divf %48, %49 : vector<16x1xf32>
    %51 = vector.broadcast %43 : vector<16x1xf32> to vector<16x32xf32>
    %52 = arith.subf %39, %51 : vector<16x32xf32>
    %cst_27 = arith.constant 9.99999974E-6 : f32
    %53 = vector.broadcast %cst_27 : f32 to vector<16x1xf32>
    %54 = arith.addf %50, %53 : vector<16x1xf32>
    %55 = math.rsqrt %54 : vector<16x1xf32>
    %56 = vector.broadcast %55 : vector<16x1xf32> to vector<16x32xf32>
    %57 = arith.mulf %52, %56 : vector<16x32xf32>
    %58 = vector.broadcast %2 : vector<1x32xf32> to vector<16x32xf32>
    %59 = arith.mulf %57, %58 : vector<16x32xf32>
    %60 = vector.broadcast %3 : vector<1x32xf32> to vector<16x32xf32>
    %61 = arith.addf %59, %60 : vector<16x32xf32>
    %62 = arith.truncf %61 : vector<16x32xf32> to vector<16x32xbf16>
    %c0_28 = arith.constant 0 : index
    %c0_29 = arith.constant 0 : index
    %c0_30 = arith.constant 0 : index
    %63 = vector.load %arg12[%c0_28, %c0_29, %c0_30] : memref<1x16x32xbf16, #tpu.memory_space<vmem>>, vector<1x16x32xbf16>
    %64 = vector.shape_cast %63 : vector<1x16x32xbf16> to vector<16x32xbf16>
    %65 = vector.shape_cast %62 : vector<16x32xbf16> to vector<1x16x32xbf16>
    tpu.vector_store %arg12[%c0_28, %c0_29, %c0_30], %65 {strides = array<i32>} : memref<1x16x32xbf16, #tpu.memory_space<vmem>>, vector<1x16x32xbf16>,
    %c0_31 = arith.constant 0 : index
    %c0_32 = arith.constant 0 : index
    %66 = vector.load %arg5[%c0_31, %c0_32] : memref<32x32xf32, #tpu.memory_space<vmem>>, vector<32x32xf32>
    %cst_33 = arith.constant dense<0.000000e+00> : vector<16x32xf32>
    %67 = tpu.matmul %1, %66, %cst_33 {dimension_numbers = #tpu.dot_dimension_numbers<[1], [0], [0], [1], [0, 0, 1, 1], [], []>} : vector<16x32xf32>, vector<32x32xf32>, vector<16x32xf32> -> vector<16x32xf32>
    %c0_34 = arith.constant 0 : index
    %c0_35 = arith.constant 0 : index
    %68 = vector.load %arg8[%c0_34, %c0_35] : memref<1x32xf32, #tpu.memory_space<vmem>>, vector<1x32xf32>
    %69 = vector.broadcast %68 : vector<1x32xf32> to vector<16x32xf32>
    %70 = arith.addf %67, %69 : vector<16x32xf32>
    %cst_36 = arith.constant dense<0.000000e+00> : vector<16xf32>
    %71 = vector.multi_reduction <add>, %70, %cst_36 [1] : vector<16x32xf32> to vector<16xf32>
    %72 = vector.shape_cast %71 : vector<16xf32> to vector<16x1xf32>
    %cst_37 = arith.constant 3.200000e+01 : f32
    %73 = vector.broadcast %cst_37 : f32 to vector<16x1xf32>
    %74 = arith.divf %72, %73 : vector<16x1xf32>
    %75 = vector.broadcast %74 : vector<16x1xf32> to vector<16x32xf32>
    %76 = arith.subf %70, %75 : vector<16x32xf32>
    %77 = arith.mulf %76, %76 : vector<16x32xf32>
    %cst_38 = arith.constant dense<0.000000e+00> : vector<16xf32>
    %78 = vector.multi_reduction <add>, %77, %cst_38 [1] : vector<16x32xf32> to vector<16xf32>
    %79 = vector.shape_cast %78 : vector<16xf32> to vector<16x1xf32>
    %cst_39 = arith.constant 3.200000e+01 : f32
    %80 = vector.broadcast %cst_39 : f32 to vector<16x1xf32>
    %81 = arith.divf %79, %80 : vector<16x1xf32>
    %82 = vector.broadcast %74 : vector<16x1xf32> to vector<16x32xf32>
    %83 = arith.subf %70, %82 : vector<16x32xf32>
    %cst_40 = arith.constant 9.99999974E-6 : f32
    %84 = vector.broadcast %cst_40 : f32 to vector<16x1xf32>
    %85 = arith.addf %81, %84 : vector<16x1xf32>
    %86 = math.rsqrt %85 : vector<16x1xf32>
    %87 = vector.broadcast %86 : vector<16x1xf32> to vector<16x32xf32>
    %88 = arith.mulf %83, %87 : vector<16x32xf32>
    %89 = vector.broadcast %2 : vector<1x32xf32> to vector<16x32xf32>
    %90 = arith.mulf %88, %89 : vector<16x32xf32>
    %91 = vector.broadcast %3 : vector<1x32xf32> to vector<16x32xf32>
    %92 = arith.addf %90, %91 : vector<16x32xf32>
    %93 = arith.truncf %92 : vector<16x32xf32> to vector<16x32xbf16>
    %c0_41 = arith.constant 0 : index
    %c0_42 = arith.constant 0 : index
    %c0_43 = arith.constant 0 : index
    %94 = vector.load %arg13[%c0_41, %c0_42, %c0_43] : memref<1x16x32xbf16, #tpu.memory_space<vmem>>, vector<1x16x32xbf16>
    %95 = vector.shape_cast %94 : vector<1x16x32xbf16> to vector<16x32xbf16>
    %96 = vector.shape_cast %93 : vector<16x32xbf16> to vector<1x16x32xbf16>
    tpu.vector_store %arg13[%c0_41, %c0_42, %c0_43], %96 {strides = array<i32>} : memref<1x16x32xbf16, #tpu.memory_space<vmem>>, vector<1x16x32xbf16>,
    return
  }
  func.func @transform_0(%arg0: i32, %arg1: i32) -> (i32, i32, i32) {
    %c0_i32 = arith.constant 0 : i32
    %c0_i32_0 = arith.constant 0 : i32
    return %arg0, %arg1, %c0_i32 : i32, i32, i32
  }
  func.func @transform_1(%arg0: i32, %arg1: i32) -> (i32, i32) {
    %c0_i32 = arith.constant 0 : i32
    %c0_i32_0 = arith.constant 0 : i32
    %c0_i32_1 = arith.constant 0 : i32
    return %c0_i32, %c0_i32_0 : i32, i32
  }
  func.func @transform_2(%arg0: i32, %arg1: i32) -> (i32, i32) {
    %c0_i32 = arith.constant 0 : i32
    %c0_i32_0 = arith.constant 0 : i32
    %c0_i32_1 = arith.constant 0 : i32
    return %c0_i32, %c0_i32_0 : i32, i32
  }
  func.func @transform_3(%arg0: i32, %arg1: i32) -> (i32, i32) {
    %c0_i32 = arith.constant 0 : i32
    %c0_i32_0 = arith.constant 0 : i32
    %c0_i32_1 = arith.constant 0 : i32
    return %c0_i32, %c0_i32_0 : i32, i32
  }
  func.func @transform_4(%arg0: i32, %arg1: i32) -> (i32, i32) {
    %c0_i32 = arith.constant 0 : i32
    %c0_i32_0 = arith.constant 0 : i32
    %c0_i32_1 = arith.constant 0 : i32
    return %c0_i32, %c0_i32_0 : i32, i32
  }
  func.func @transform_5(%arg0: i32, %arg1: i32) -> (i32, i32) {
    %c0_i32 = arith.constant 0 : i32
    %c0_i32_0 = arith.constant 0 : i32
    %c0_i32_1 = arith.constant 0 : i32
    return %c0_i32, %c0_i32_0 : i32, i32
  }
  func.func @transform_6(%arg0: i32, %arg1: i32) -> (i32, i32) {
    %c0_i32 = arith.constant 0 : i32
    %c0_i32_0 = arith.constant 0 : i32
    %c0_i32_1 = arith.constant 0 : i32
    return %c0_i32, %c0_i32_0 : i32, i32
  }
  func.func @transform_7(%arg0: i32, %arg1: i32) -> (i32, i32) {
    %c0_i32 = arith.constant 0 : i32
    %c0_i32_0 = arith.constant 0 : i32
    %c0_i32_1 = arith.constant 0 : i32
    return %c0_i32, %c0_i32_0 : i32, i32
  }
  func.func @transform_8(%arg0: i32, %arg1: i32) -> (i32, i32) {
    %c0_i32 = arith.constant 0 : i32
    %c0_i32_0 = arith.constant 0 : i32
    %c0_i32_1 = arith.constant 0 : i32
    return %c0_i32, %c0_i32_0 : i32, i32
  }
  func.func @transform_9(%arg0: i32, %arg1: i32) -> (i32, i32, i32) {
    %c0_i32 = arith.constant 0 : i32
    %c0_i32_0 = arith.constant 0 : i32
    return %arg0, %arg1, %c0_i32 : i32, i32, i32
  }
  func.func @transform_10(%arg0: i32, %arg1: i32) -> (i32, i32, i32) {
    %c0_i32 = arith.constant 0 : i32
    %c0_i32_0 = arith.constant 0 : i32
    return %arg0, %arg1, %c0_i32 : i32, i32, i32
  }
  func.func @transform_11(%arg0: i32, %arg1: i32) -> (i32, i32, i32) {
    %c0_i32 = arith.constant 0 : i32
    %c0_i32_0 = arith.constant 0 : i32
    return %arg0, %arg1, %c0_i32 : i32, i32, i32
  }
}

</mosaic_0001>

<bundles_post_ra>
// kernel: self_attention.3
= control target key start
LH: loop header
LB: loop body
LE: loop exit
PB: predicated region body
PF: predicated region fallthrough
CT: control target
= control target key end

     0   :  { %s713_s12 = smov 0   ;;  %s715_s13 = smov 0   ;;  %s782_s0 = inlined_call_operand.vmem [shape: bf16[2,16,32], index: 0, kind: input, shape index: {}]   ;;  %s783_s1 = inlined_call_operand.vmem [shape: bf16[2,16,32], index: 1, kind: input, shape index: {}]   ;;  %s784_s2 = inlined_call_operand.vmem [shape: bf16[2,16,32], index: 2, kind: input, shape index: {}]   ;;  %s785_s3 = inlined_call_operand.vmem [shape: f32[2,16,32], index: 3, kind: output, shape index: {}]  }
   0x1   :  { %s717_s14 = smov 0  }
   0x2 LB: > { %s32_s15 = sadd.s32 1, %s684_s13  ;;  %p592_p0 = scmp.ge.s32.totalorder %s688_s14, 1  ;;  %s688_s14 = sphi %s717_s14, %s13_s14   ;;  %s684_s13 = sphi %s715_s13, %s787_s13   ;;  %s680_s12 = sphi %s713_s12, %s786_s12  }
   0x3   : > { %p34_p1 = scmp.ge.s32.totalorder %s32_s15, 2  ;;  %p199_p2 = scmp.lt.s32.totalorder %s688_s14, 3 }
   0x5   : > { %s789_s15 = smov (%p34_p1, %s32_s15), 0  ;;  %p200_p3 = pnand %p592_p0, %p199_p2 }
   0x6   : > { %p250_p4 = scmp.lt.s32.totalorder (!%p200_p3), %s680_s12, 1 }
   0x7   : > { %203 = sbr.rel (%p200_p3) target bundleno = 656 (0x290), region = 32 }
   0xc   : > { %vm299_vm0 = vcmask 261120   ;;  %v690_v0 = vmov 0.0   ;;  %s791_s12 = smov (!%p250_p4, %s680_s12), 1  ;;  %vm294_vm1 = vcmask 7168   ;;  %v691_v4 = vmov -inf  }
   0xd   : > { %300 = vst.msk [vmem:[#allocation4] sm:$0xff] %vm299_vm0, %v690_v0  ;;  %s736_s16 = sshll.u32 %s791_s12, 3  ;;  %v340_v5 = vlaneseq  ;;  %vm349_vm3 = vcmask 130048   ;;  %v692_v13 = vmov 0   ;;  %s620_s26 = sshll.u32 %s791_s12, 4 }
   0xe   : > { %301 = vst.msk [vmem:[#allocation4 + $0x8] sm:$0xff] %vm299_vm0, %v690_v0  ;;  %s267_s19 = scalar_lea.vmem %s783_s1, %s736_s16  ;;  %s257_s22 = scalar_lea.vmem %s782_s0, %s736_s16  ;;  %651 = vset.pattern.permute.xlu1 %v692_v13  ;;  %652 = vset.pattern.permute.xlu0 %v692_v13 }
   0xf   : > { %v622_v1 = vld [vmem:[%s267_s19] sm:$0xff]  ;;  %295 = vst.msk [vmem:[#allocation2] sm:$0xff] %vm294_vm1, %v691_v4  ;;  %v341_v6 = vand.u32 127, %v340_v5  ;;  %653 = vset.pattern.permute.xlu2 %v692_v13  ;;  %s277_s25 = scalar_lea.vmem %s784_s2, %s736_s16  ;;  %s287_s29 = scalar_lea.vmem %s785_s3, %s620_s26 }
  0x10   : > { %v323_v2 = vsel %vm299_vm0, %v622_v1, 0  ;;  %v621_v3 = vld [vmem:[%s257_s22] sm:$0xff]  ;;  %296 = vst.msk [vmem:[#allocation2 + $0x8] sm:$0xff] %vm294_vm1, %v691_v4 }
  0x11   : > { %332 = vmatpush.bf16.xpose.msra.mxu0 %v323_v2  ;;  %297 = vst.msk [vmem:[#allocation3] sm:$0xff] %vm294_vm1, %v690_v0  ;;  %vm344_vm2 = vcmp.lt.s32.totalorder %v341_v6, 8  ;;  %v623_v26 = vld [vmem:[%s277_s25] sm:$0xff] }
  0x12   : > { %298 = vst.msk [vmem:[#allocation3 + $0x8] sm:$0xff] %vm294_vm1, %v690_v0  ;;  %426 = vmatpush.bf16.msra.mxu1 %v623_v26 }
  0x14   : > { %v395_v47 = vld [vmem:[#allocation4] sm:$0xff] }
  0x15   : > { %v396_v54 = vld [vmem:[#allocation4 + $0x8] sm:$0xff] }
  0x16   : > { %v347_v14 = vld [vmem:[#allocation2] sm:$0xff] }
  0x17   : > { %v348_v19 = vld [vmem:[#allocation2 + $0x8] sm:$0xff] }
  0x18   : > { %609 = vmatmul.msk.bf16.vlgmr.msra.gmra.mxu0 %vm299_vm0, %v621_v3  ;;  %v380_v38 = vld [vmem:[#allocation3] sm:$0xff] }
  0x19   : > { %v381_v42 = vld [vmem:[#allocation3 + $0x8] sm:$0xff] }
  0x95   : > { %v334_v7 = vpop.f32.mrf.mxu0 }
  0x96   : > { %v345_v8 = vsel %vm344_vm2, %v334_v7, -inf }
  0x97   : > { %v350_v9 = vsel %vm349_vm3, %v345_v8, -inf }
  0x98   : > { %351 = vmax.xlane.f32.xlu0 %v350_v9 }
  0x9d   : > { %v336_v10 = vpop.f32.mrf.mxu0 }
  0x9e   : > { %v346_v11 = vsel %vm344_vm2, %v336_v10, -inf }
  0x9f   : > { %v353_v12 = vsel %vm349_vm3, %v346_v11, -inf }
  0xa0   : > { %354 = vmax.xlane.f32.xlu0 %v353_v12 }
 0x10b   : > { %v352_v15 = vpop.xlane.xlu0 %351 }
 0x10c   : > { %v356_v16 = vmax.f32 %v347_v14, %v352_v15 }
 0x10e   : > { %v358_v17 = vsub.f32 %v347_v14, %v356_v16  ;;  %437 = vst.msk [vmem:[#allocation2] sm:$0xff] %vm294_vm1, %v356_v16  ;;  %366 = vperm.xlu1 %651, %v356_v16  }
 0x110   : > { %v360_v18 = vmul.f32 1.442695, %v358_v17 }
 0x112   : > { %654 = vpow2.f32 %v360_v18 }
 0x113   : > { %v355_v20 = vpop.xlane.xlu0 %354 }
 0x114   : > { %v357_v21 = vmax.f32 %v348_v19, %v355_v20 }
 0x116   : > { %v359_v22 = vsub.f32 %v348_v19, %v357_v21  ;;  %438 = vst.msk [vmem:[#allocation2 + $0x8] sm:$0xff] %vm294_vm1, %v357_v21  ;;  %371 = vperm.xlu1 %651, %v357_v21  }
 0x118   : > { %v655_v23 = vpop.eup %654  ;;  %v362_v24 = vmul.f32 1.442695, %v359_v22 }
 0x119   : > { %399 = vperm.xlu0 %652, %v655_v23   ;;  %v382_v39 = vmul.f32 %v655_v23, %v380_v38 }
 0x11a   : > { %656 = vpow2.f32 %v362_v24 }
 0x120   : > { %v657_v25 = vpop.eup %656 }
 0x121   : > { %404 = vperm.xlu1 %651, %v657_v25   ;;  %v383_v43 = vmul.f32 %v657_v25, %v381_v42 }
 0x180   : > { %v367_v27 = vpop.permute.xlu1 %366 }
 0x181   : > { %v374_v28 = vsub.f32 %v345_v8, %v367_v27 }
 0x183   : > { %v376_v29 = vmul.f32 1.442695, %v374_v28 }
 0x185   : > { %658 = vpow2.f32 %v376_v29 }
 0x188   : > { %v372_v30 = vpop.permute.xlu1 %371 }
 0x189   : > { %v375_v31 = vsub.f32 %v346_v11, %v372_v30 }
 0x18b   : > { %v659_v32 = vpop.eup %658  ;;  %v378_v33 = vmul.f32 1.442695, %v375_v31  ;;  %v400_v48 = vpop.permute.xlu0 %399 }
 0x18c   : > { %v384_v34 = vsel %vm349_vm3, %v659_v32, 0.0  ;;  %v407_v50 = vmul.f32 %v400_v48, %v395_v47 }
 0x18d   : > { %660 = vpow2.f32 %v378_v33  ;;  %385 = vadd.xlane.f32.xlu2 %v384_v34 }
 0x193   : > { %v661_v35 = vpop.eup %660  ;;  %v405_v55 = vpop.permute.xlu1 %404 }
 0x194   : > { %v387_v36 = vsel %vm349_vm3, %v661_v35, 0.0  ;;  %v409_v37 = vpack.c.bf16 %v661_v35, %v659_v32  ;;  %v408_v57 = vmul.f32 %v405_v55, %v396_v54 }
 0x195   : > { %388 = vadd.xlane.f32.xlu2 %v387_v36 }
 0x196   : > { %614 = vmatmul.msk.bf16.vlgmr.msra.gmra.mxu1 %vm349_vm3, %v409_v37 }
 0x200   : > { %v386_v40 = vpop.xlane.xlu2 %385 }
 0x201   : > { %v390_v41 = vadd.f32 %v386_v40, %v382_v39 }
 0x203   : > { %393 = vst.msk [vmem:[#allocation3] sm:$0xff] %vm294_vm1, %v390_v41 }
 0x208   : > { %v389_v44 = vpop.xlane.xlu2 %388 }
 0x209   : > { %v391_v45 = vadd.f32 %v389_v44, %v383_v43 }
 0x20a   : > { %v442_v46 = vld [vmem:[#allocation3] sm:$0xff] }
 0x20b   : > { %394 = vst.msk [vmem:[#allocation3 + $0x8] sm:$0xff] %vm294_vm1, %v391_v45  ;;  %662 = vrcp.f32 %v442_v46 }
 0x211   : > { %v663_v49 = vpop.eup %662 }
 0x212   : > { %450 = vperm.xlu2 %653, %v663_v49   ;;  %v443_v51 = vld [vmem:[#allocation3 + $0x8] sm:$0xff] }
 0x213   : > { %v428_v52 = vpop.f32.mrf.mxu1  ;;  %664 = vrcp.f32 %v443_v51 }
 0x214   : > { %v433_v53 = vadd.f32 %v428_v52, %v407_v50 }
 0x216   : > { %435 = vst.msk [vmem:[#allocation4] sm:$0xff] %vm299_vm0, %v433_v53 }
 0x219   : > { %v665_v56 = vpop.eup %664 }
 0x21a   : > { %455 = vperm.xlu1 %651, %v665_v56  }
 0x21b   : > { %v430_v58 = vpop.f32.mrf.mxu1 }
 0x21c   : > { %v434_v59 = vadd.f32 %v430_v58, %v408_v57 }
 0x21d   : > { %v446_v61 = vld [vmem:[#allocation4] sm:$0xff] }
 0x21e   : > { %436 = vst.msk [vmem:[#allocation4 + $0x8] sm:$0xff] %vm299_vm0, %v434_v59 }
 0x225   : > { %v447_v63 = vld [vmem:[#allocation4 + $0x8] sm:$0xff] }
 0x26c   : > { %v451_v60 = vpop.permute.xlu2 %450 }
 0x26d   : > { %v458_v62 = vmul.f32 %v451_v60, %v446_v61 }
 0x26f   : > { %460 = vst.msk [vmem:[%s287_s29] sm:$0xff] %vm299_vm0, %v458_v62 }
 0x28c   : > { %v456_v0 = vpop.permute.xlu1 %455 }
 0x28d   : > { %v459_v1 = vmul.f32 %v456_v0, %v447_v63 }
 0x28f   : > { %461 = vst.msk [vmem:[%s287_s29 + $0x8] sm:$0xff] %vm299_vm0, %v459_v1 }
 0x290 PF: > { %s13_s14 = sadd.s32 1, %s688_s14   ;;  %s786_s12 = smov %s684_s13 }
 0x291   : > { %p10_p5 = scmp.ge.s32.totalorder %s13_s14, 4   ;;  %s787_s13 = smov %s789_s15 }
 0x293   :  { %12 = sbr.rel (!%p10_p5) target bundleno = 2 (0x2), region = 76 }

// kernel: self_attention.2
= control target key start
LH: loop header
LB: loop body
LE: loop exit
PB: predicated region body
PF: predicated region fallthrough
CT: control target
= control target key end

     0   :  { %17 = vsyncpa [#allocation3], 0  ;;  %s1462_s0 = inlined_call_operand.vmem [shape: f32[2,16,32], index: 0, kind: input, shape index: {}]   ;;  %s1463_s1 = inlined_call_operand.vmem [shape: f32[32,32], index: 1, kind: input, shape index: {}]   ;;  %s1464_s2 = inlined_call_operand.hbm [shape: f32[32,32], index: 2, kind: input, shape index: {}]   ;;  %s1465_s3 = inlined_call_operand.hbm [shape: f32[32,32], index: 3, kind: input, shape index: {}]   ;;  %s1466_s4 = inlined_call_operand.vmem [shape: f32[1,32], index: 4, kind: input, shape index: {}]   ;;  %s1467_s5 = inlined_call_operand.vmem [shape: f32[1,32], index: 5, kind: input, shape index: {}]   ;;  %s1468_s6 = inlined_call_operand.vmem [shape: f32[1,32], index: 6, kind: input, shape index: {}]   ;;  %s1469_s7 = inlined_call_operand.vmem [shape: f32[1,32], index: 7, kind: input, shape index: {}]   ;;  %s1470_s8 = inlined_call_operand.vmem [shape: f32[1,32], index: 8, kind: input, shape index: {}]   ;;  %s1471_s9 = inlined_call_operand.vmem [shape: bf16[2,16,32], index: 9, kind: output, shape index: {0}]   ;;  %s1472_s10 = inlined_call_operand.vmem [shape: bf16[2,16,32], index: 10, kind: output, shape index: {1}]   ;;  %s1473_s11 = inlined_call_operand.vmem [shape: bf16[2,16,32], index: 11, kind: output, shape index: {2}]  }
   0x1   :  { %18 = vsyncpa [#allocation5], 0  ;;  %s1247_s17 = smov 0   ;;  %s1249_s18 = smov 0  }
   0x2   :  { %s1251_s19 = smov 0  }
   0x3 LB: > { %s990_s20 = sadd.s32 4294967295, %s1180_s19   ;;  %s36_s21 = sadd.s32 1, %s1176_s18  ;;  %s1180_s19 = sphi %s1251_s19, %s24_s19   ;;  %s1176_s18 = sphi %s1249_s18, %s1477_s18   ;;  %s1172_s17 = sphi %s1247_s17, %s1476_s17  }
   0x4   : > { %p38_p0 = scmp.ge.s32.totalorder %s36_s21, 2  ;;  %p992_p1 = scmp.ge.s32.totalorder %s1180_s19, 1 }
   0x5   : > { %p321_p2 = scmp.lt.s32.totalorder %s1180_s19, 3  ;;  %p1272_p4 = scmp.eq.s32.totalorder %s990_s20, 0 }
   0x6   : > { %s1479_s21 = smov (%p38_p0, %s36_s21), 0  ;;  %s335_s26 = sshll.u32 %s1464_s2, 4  ;;  %s336_s26 = int_to_ptr.hbm [resolvable:$true] %s335_s26 }
   0x7   : > { %p1268_p3 = pnand %p992_p1, %p321_p2  ;;  %s1182_s27 = smov [#allocation2]  }
   0x8   : > { %s337_s28 = sshll.u32 %s1182_s27, 4  ;;  %s349_s12 = sshll.u32 %s1465_s3, 4  ;;  %s338_s28 = int_to_ptr.vmem [resolvable:$true] %s337_s28  ;;  %s350_s12 = int_to_ptr.hbm [resolvable:$true] %s349_s12 }
   0x9   : > { %p1031_p5 = pneg %p1268_p3  ;;  %s1183_s13 = smov 128  }
   0xa   : > { %s1184_s14 = smov 8   ;;  %s1185_s15 = smov [#allocation4]  }
   0xb   : > { %p1032_p6 = pnand %p1272_p4, %p1031_p5  ;;  %s351_s16 = sshll.u32 %s1185_s15, 4  ;;  %s352_s16 = int_to_ptr.vmem [resolvable:$true] %s351_s16 }
   0xc   : > { %395 = sbr.rel (%p1268_p3) target bundleno = 444 (0x1bc), region = 56 }
   0xd   : > { %1034 = dma.hbm_to_vmem [thread:$0]  (!%p1032_p6), %s336_s26, 512, %s338_s28, [#allocation3], %s1183_s13, %s1183_s13, %s1184_s14  }
   0xe   : > { %1037 = dma.hbm_to_vmem [thread:$0]  (!%p1032_p6), %s350_s12, 512, %s352_s16, [#allocation5], %s1183_s13, %s1183_s13, %s1184_s14  }
  0x11   : > { %1163 = dma.done.wait (%p1272_p4), [#allocation3], 512  }
  0x12   : > { %1165 = vsyncadd (%p1272_p4), [#allocation3], 4294966784 }
  0x13   : > { %1167 = dma.done.wait (%p1272_p4), [#allocation5], 512  }
  0x14   : > { %1169 = vsyncadd (%p1272_p4), [#allocation5], 4294966784  ;;  %p468_p7 = scmp.lt.s32.totalorder %s1172_s17, 1  ;;  %v514_v0 = vld [vmem:[%s1463_s1 + $0x18] sm:$0xff]  ;;  %v513_v3 = vld [vmem:[%s1463_s1 + $0x10] sm:$0xff]  ;;  %vm519_vm0 = vcmask 261120  }
  0x15   : > { %v618_v1 = vld [vmem:[#allocation2 + $0x18] sm:$0xff]  ;;  %538 = vmatpush.msra.mxu0 %v514_v0  ;;  %v617_v4 = vld [vmem:[#allocation2 + $0x10] sm:$0xff]  ;;  %1019 = vmatpush.msra.mxu3 %v514_v0  ;;  %v512_v6 = vld [vmem:[%s1463_s1 + $0x8] sm:$0xff]  ;;  %v1186_v35 = vmov 32.0   ;;  %vm612_vm8 = vcmask 257024  }
  0x16   : > { %s1481_s17 = smov (!%p468_p7, %s1172_s17), 1  ;;  %v701_v2 = vld [vmem:[#allocation4 + $0x18] sm:$0xff]  ;;  %635 = vmatpush.msra.mxu1 %v618_v1  ;;  %v700_v5 = vld [vmem:[#allocation4 + $0x10] sm:$0xff]  ;;  %v616_v7 = vld [vmem:[#allocation2 + $0x8] sm:$0xff]  ;;  %1076 = vrcp.f32 %v1186_v35 }
  0x17   : > { %s1015_s20 = sshll.u32 %s1481_s17, 4  ;;  %718 = vmatpush.msra.mxu2 %v701_v2  ;;  %539 = vmatpush.msra.mxu0 %v513_v3  ;;  %v699_v8 = vld [vmem:[#allocation4 + $0x8] sm:$0xff]  ;;  %v511_v9 = vld [vmem:[%s1463_s1] sm:$0xff]  ;;  %s1404_s28 = sshll.u32 %s1481_s17, 3 }
  0x18   : > { %s475_s30 = scalar_lea.vmem %s1462_s0, %s1015_s20  ;;  %636 = vmatpush.msra.mxu1 %v617_v4  ;;  %1020 = vmatpush.msra.mxu3 %v513_v3  ;;  %v615_v10 = vld [vmem:[#allocation2] sm:$0xff]  ;;  %s1421_s14 = scalar_lea.vmem %s1472_s10, %s1404_s28 }
  0x19   : > { %719 = vmatpush.msra.mxu2 %v700_v5  ;;  %v698_v11 = vld [vmem:[#allocation4] sm:$0xff]  ;;  %540 = vmatpush.msra.mxu0 %v512_v6  ;;  %v508_v13 = vld [vmem:[%s475_s30 + $0x8] sm:$0xff]  ;;  %s505_s20 = scalar_lea.vmem %s1473_s11, %s1404_s28 }
  0x1a   : > { %637 = vmatpush.msra.mxu1 %v616_v7  ;;  %v507_v12 = vld [vmem:[%s475_s30] sm:$0xff]  ;;  %1021 = vmatpush.msra.mxu3 %v512_v6  ;;  %s1414_s30 = scalar_lea.vmem %s1471_s9, %s1404_s28 }
  0x1b   : > { %720 = vmatpush.msra.mxu2 %v699_v8  ;;  %541 = vmatpush.msra.mxu0 %v511_v9  ;;  %v1071_v14 = vld [vmem:[%s1466_s4] ss:$0 sm:$0xff] }
  0x1c   : > { %638 = vmatpush.msra.mxu1 %v615_v10  ;;  %1007 = vmatmul.msk.f32.vlgmr.msra.gmra.mxu0 %vm519_vm0, %v507_v12  ;;  %v1072_v15 = vld [vmem:[%s1467_s5] ss:$0 sm:$0xff]  ;;  %v1077_v36 = vpop.eup %1076 }
  0x1d   : > { %721 = vmatpush.msra.mxu2 %v698_v11  ;;  %1009 = vmatmul.msk.f32.vlgmr.msra.gmra.mxu1 %vm519_vm0, %v507_v12  ;;  %v1073_v22 = vld [vmem:[%s1468_s6] ss:$0 sm:$0xff]  ;;  %v556_v37 = vmul.f32 32.0, %v1077_v36  ;;  %vm560_vm1 = vweird.f32 %v1077_v36 }
  0x1e   : > { %1011 = vmatmul.msk.f32.vlgmr.msra.gmra.mxu2 %vm519_vm0, %v507_v12  ;;  %1022 = vmatpush.msra.mxu3 %v511_v9 }
  0x1f   : > { %1008 = vmatmul.msk.f32.vlgmr.msra.gmra.mxu3 %vm519_vm0, %v508_v13  ;;  %v557_v38 = vsub.f32 1.0, %v556_v37 }
  0x21   : > { %v558_v39 = vmul.f32 %v1077_v36, %v557_v38 }
  0x23   : > { %v559_v40 = vadd.f32 %v1077_v36, %v558_v39  ;;  %v1392_v39 = vld [vmem:[%s1469_s7] ss:$0 sm:$0xff] }
  0x25   : > { %1010 = vmatmul.msk.f32.gmra.mxu1 %vm519_vm0, %v508_v13  ;;  %v1337_v41 = vsel %vm560_vm1, %v1077_v36, %v559_v40 }
  0x26   : > { %1012 = vmatmul.msk.f32.gmra.mxu2 %vm519_vm0, %v508_v13 }
  0x99   : > { %v543_v16 = vpop.f32.mrf.mxu0 }
  0x9a   : > { %v544_v17 = vadd.f32 %v1071_v14, %v543_v16  ;;  %v640_v18 = vpop.f32.mrf.mxu1 }
  0x9b   : > { %v641_v19 = vadd.f32 %v1072_v15, %v640_v18 }
  0x9c   : > { %v549_v20 = vsel %vm519_vm0, %v544_v17, 0.0 }
  0x9d   : > { %v646_v21 = vsel %vm519_vm0, %v641_v19, 0.0  ;;  %550 = vadd.xlane.f32.xlu0 %v549_v20 }
  0x9e   : > { %647 = vadd.xlane.f32.xlu1 %v646_v21 }
  0xa1   : > { %v723_v23 = vpop.f32.mrf.mxu2 }
  0xa2   : > { %v724_v24 = vadd.f32 %v1073_v22, %v723_v23  ;;  %v546_v25 = vpop.f32.mrf.mxu3  ;;  %v643_v26 = vpop.f32.mrf.mxu1 }
  0xa3   : > { %v547_v27 = vadd.f32 %v1071_v14, %v546_v25  ;;  %v644_v28 = vadd.f32 %v1072_v15, %v643_v26 }
  0xa4   : > { %v729_v29 = vsel %vm519_vm0, %v724_v24, 0.0 }
  0xa5   : > { %730 = vadd.xlane.f32.xlu2 %v729_v29  ;;  %v649_v30 = vsel %vm519_vm0, %v644_v28, 0.0  ;;  %v552_v31 = vsel %vm519_vm0, %v547_v27, 0.0 }
  0xa6   : > { %650 = vadd.xlane.f32.xlu1 %v649_v30  ;;  %553 = vadd.xlane.f32.xlu0 %v552_v31 }
  0xa9   : > { %v726_v32 = vpop.f32.mrf.mxu2 }
  0xaa   : > { %v727_v33 = vadd.f32 %v1073_v22, %v726_v32 }
  0xac   : > { %v732_v34 = vsel %vm519_vm0, %v727_v33, 0.0 }
  0xad   : > { %733 = vadd.xlane.f32.xlu2 %v732_v34 }
 0x110   : > { %v551_v42 = vpop.xlane.xlu0 %550 }
 0x111   : > { %v648_v43 = vpop.xlane.xlu1 %647  ;;  %v562_v44 = vmul.f32 %v1337_v41, %v551_v42 }
 0x112   : > { %v652_v45 = vmul.f32 %v648_v43, %v1337_v41 }
 0x113   : > { %v1341_v46 = vsub.f32 %v544_v17, %v562_v44  ;;  %v1399_v44 = vld [vmem:[%s1470_s8] ss:$0 sm:$0xff] }
 0x114   : > { %v1343_v47 = vsub.f32 %v641_v19, %v652_v45 }
 0x115   : > { %v566_v48 = vmul.f32 %v1341_v46, %v1341_v46 }
 0x116   : > { %v656_v49 = vmul.f32 %v1343_v47, %v1343_v47 }
 0x117   : > { %v568_v51 = vsel %vm519_vm0, %v566_v48, 0.0 }
 0x118   : > { %v731_v50 = vpop.xlane.xlu2 %730  ;;  %v658_v52 = vsel %vm519_vm0, %v656_v49, 0.0  ;;  %569 = vadd.xlane.f32.xlu0 %v568_v51 }
 0x119   : > { %659 = vadd.xlane.f32.xlu2 %v658_v52  ;;  %v651_v53 = vpop.xlane.xlu1 %650  ;;  %v554_v54 = vpop.xlane.xlu0 %553  ;;  %v735_v57 = vmul.f32 %v731_v50, %v1337_v41 }
 0x11a   : > { %v653_v55 = vmul.f32 %v651_v53, %v1337_v41  ;;  %v563_v56 = vmul.f32 %v1337_v41, %v554_v54 }
 0x11b   : > { %v1362_v63 = vsub.f32 %v724_v24, %v735_v57 }
 0x11c   : > { %v1354_v58 = vsub.f32 %v644_v28, %v653_v55  ;;  %v1356_v59 = vsub.f32 %v547_v27, %v563_v56 }
 0x11d   : > { %v739_v5 = vmul.f32 %v1362_v63, %v1362_v63 }
 0x11e   : > { %v657_v60 = vmul.f32 %v1354_v58, %v1354_v58  ;;  %v567_v61 = vmul.f32 %v1356_v59, %v1356_v59 }
 0x11f   : > { %v741_v7 = vsel %vm519_vm0, %v739_v5, 0.0 }
 0x120   : > { %v734_v62 = vpop.xlane.xlu2 %733  ;;  %v661_v1 = vsel %vm519_vm0, %v657_v60, 0.0  ;;  %v571_v2 = vsel %vm519_vm0, %v567_v61, 0.0 }
 0x121   : > { %v736_v0 = vmul.f32 %v734_v62, %v1337_v41  ;;  %662 = vadd.xlane.f32.xlu0 %v661_v1  ;;  %572 = vadd.xlane.f32.xlu1 %v571_v2 }
 0x123   : > { %v1367_v3 = vsub.f32 %v727_v33, %v736_v0 }
 0x125   : > { %v740_v4 = vmul.f32 %v1367_v3, %v1367_v3 }
 0x127   : > { %v744_v6 = vsel %vm519_vm0, %v740_v4, 0.0 }
 0x128   : > { %745 = vadd.xlane.f32.xlu2 %v744_v6 }
 0x129   : > { %742 = vadd.xlane.f32.xlu1 %v741_v7 }
 0x18b   : > { %v570_v8 = vpop.xlane.xlu0 %569 }
 0x18c   : > { %v660_v9 = vpop.xlane.xlu2 %659  ;;  %v574_v10 = vmul.f32 %v570_v8, %v1337_v41 }
 0x18d   : > { %v664_v11 = vmul.f32 %v660_v9, %v1337_v41 }
 0x18e   : > { %v576_v12 = vadd.f32 1e-05, %v574_v10 }
 0x18f   : > { %v666_v13 = vadd.f32 1e-05, %v664_v11 }
 0x190   : > { %1078 = vrsqrt.f32 %v576_v12  ;;  %vm584_vm4 = vweird.f32 %v576_v12 }
 0x191   : > { %1080 = vrsqrt.f32 %v666_v13  ;;  %vm674_vm5 = vweird.f32 %v666_v13 }
 0x194   : > { %v573_v14 = vpop.xlane.xlu1 %572  ;;  %v663_v15 = vpop.xlane.xlu0 %662 }
 0x195   : > { %v575_v16 = vmul.f32 %v573_v14, %v1337_v41  ;;  %v665_v17 = vmul.f32 %v663_v15, %v1337_v41 }
 0x196   : > { %v1079_v18 = vpop.eup %1078 }
 0x197   : > { %v1081_v19 = vpop.eup %1080  ;;  %v579_v20 = vmul.f32 %v1079_v18, %v576_v12  ;;  %v577_v21 = vadd.f32 1e-05, %v575_v16  ;;  %v1379_v22 = vadd.f32 1e-05, %v665_v17  ;;  %vm585_vm2 = vweird.f32 %v1079_v18 }
 0x198   : > { %v669_v23 = vmul.f32 %v1081_v19, %v666_v13  ;;  %vm675_vm3 = vweird.f32 %v1081_v19  ;;  %vm586_vm6 = vmor %vm584_vm4, %vm585_vm2 }
 0x199   : > { %v580_v24 = vmul.f32 %v1079_v18, %v579_v20  ;;  %1082 = vrsqrt.f32 %v577_v21  ;;  %vm676_vm7 = vmor %vm674_vm5, %vm675_vm3  ;;  %vm594_vm10 = vweird.f32 %v577_v21  ;;  %vm684_vm13 = vweird.f32 %v1379_v22 }
 0x19a   : > { %v670_v25 = vmul.f32 %v1081_v19, %v669_v23  ;;  %1084 = vrsqrt.f32 %v1379_v22 }
 0x19b   : > { %v746_v26 = vpop.xlane.xlu2 %745  ;;  %v581_v27 = vmul.f32 0.5, %v580_v24 }
 0x19c   : > { %v748_v28 = vmul.f32 %v746_v26, %v1337_v41  ;;  %v671_v29 = vmul.f32 0.5, %v670_v25  ;;  %v743_v30 = vpop.xlane.xlu1 %742 }
 0x19d   : > { %v582_v31 = vsub.f32 1.5, %v581_v27  ;;  %v747_v33 = vmul.f32 %v743_v30, %v1337_v41 }
 0x19e   : > { %v1383_v32 = vadd.f32 1e-05, %v748_v28  ;;  %v672_v34 = vsub.f32 1.5, %v671_v29 }
 0x19f   : > { %v1083_v35 = vpop.eup %1082  ;;  %v583_v36 = vmul.f32 %v1079_v18, %v582_v31  ;;  %v1387_v37 = vadd.f32 1e-05, %v747_v33 }
 0x1a0   : > { %1086 = vrsqrt.f32 %v1383_v32  ;;  %v1085_v38 = vpop.eup %1084  ;;  %v673_v40 = vmul.f32 %v1081_v19, %v672_v34  ;;  %v589_v41 = vmul.f32 %v1083_v35, %v577_v21  ;;  %vm595_vm9 = vweird.f32 %v1083_v35 }
 0x1a1   : > { %v587_v42 = vsel %vm586_vm6, %v1079_v18, %v583_v36  ;;  %v679_v43 = vmul.f32 %v1085_v38, %v1379_v22  ;;  %1088 = vrsqrt.f32 %v1387_v37  ;;  %vm685_vm11 = vweird.f32 %v1085_v38  ;;  %vm596_vm12 = vmor %vm594_vm10, %vm595_vm9 }
 0x1a2   : > { %v677_v45 = vsel %vm676_vm7, %v1081_v19, %v673_v40  ;;  %v598_v48 = vmul.f32 %v587_v42, %v1341_v46  ;;  %v590_v49 = vmul.f32 %v1083_v35, %v589_v41  ;;  %vm686_vm14 = vmor %vm684_vm13, %vm685_vm11  ;;  %vm767_vm0 = vweird.f32 %v1383_v32 }
 0x1a3   : > { %v688_v50 = vmul.f32 %v677_v45, %v1343_v47  ;;  %v680_v51 = vmul.f32 %v1085_v38, %v679_v43  ;;  %vm757_vm3 = vweird.f32 %v1387_v37 }
 0x1a4   : > { %v603_v52 = vmul.f32 %v1392_v39, %v598_v48  ;;  %v591_v53 = vmul.f32 0.5, %v590_v49 }
 0x1a5   : > { %v690_v55 = vmul.f32 %v1392_v39, %v688_v50  ;;  %v681_v56 = vmul.f32 0.5, %v680_v51 }
 0x1a6   : > { %v1087_v54 = vpop.eup %1086  ;;  %v608_v57 = vadd.f32 %v1399_v44, %v603_v52  ;;  %v592_v60 = vsub.f32 1.5, %v591_v53 }
 0x1a7   : > { %v762_v46 = vmul.f32 %v1087_v54, %v1383_v32  ;;  %v1089_v47 = vpop.eup %1088  ;;  %v692_v61 = vadd.f32 %v1399_v44, %v690_v55  ;;  %v682_v62 = vsub.f32 1.5, %v681_v56  ;;  %vm768_vm15 = vweird.f32 %v1087_v54 }
 0x1a8   : > { %v610_v0 = vpack.c.bf16 %v608_v57, %v608_v57  ;;  %v593_v1 = vmul.f32 %v1083_v35, %v592_v60  ;;  %v752_v4 = vmul.f32 %v1089_v47, %v1387_v37  ;;  %vm758_vm1 = vweird.f32 %v1089_v47  ;;  %vm769_vm2 = vmor %vm767_vm0, %vm768_vm15 }
 0x1a9   : > { %v763_v2 = vmul.f32 %v1087_v54, %v762_v46  ;;  %v694_v5 = vpack.c.bf16 %v692_v61, %v692_v61  ;;  %v683_v6 = vmul.f32 %v1085_v38, %v682_v62  ;;  %vm759_vm4 = vmor %vm757_vm3, %vm758_vm1 }
 0x1aa   : > { %613 = vst.msk [vmem:[%s1414_s30] sm:$0xf] %vm612_vm8, %v610_v0  ;;  %v597_v7 = vsel %vm596_vm12, %v1083_v35, %v593_v1  ;;  %v753_v9 = vmul.f32 %v1089_v47, %v752_v4 }
 0x1ab   : > { %v764_v8 = vmul.f32 0.5, %v763_v2  ;;  %696 = vst.msk [vmem:[%s1421_s14] sm:$0xf] %vm612_vm8, %v694_v5  ;;  %v599_v10 = vmul.f32 %v597_v7, %v1356_v59  ;;  %v687_v11 = vsel %vm686_vm14, %v1085_v38, %v683_v6 }
 0x1ac   : > { %v689_v12 = vmul.f32 %v687_v11, %v1354_v58  ;;  %v754_v14 = vmul.f32 0.5, %v753_v9 }
 0x1ad   : > { %v765_v13 = vsub.f32 1.5, %v764_v8  ;;  %v604_v15 = vmul.f32 %v1392_v39, %v599_v10 }
 0x1ae   : > { %v691_v16 = vmul.f32 %v1392_v39, %v689_v12  ;;  %v755_v18 = vsub.f32 1.5, %v754_v14 }
 0x1af   : > { %v766_v17 = vmul.f32 %v1087_v54, %v765_v13  ;;  %v609_v19 = vadd.f32 %v1399_v44, %v604_v15 }
 0x1b0   : > { %v693_v58 = vadd.f32 %v1399_v44, %v691_v16  ;;  %v756_v20 = vmul.f32 %v1089_v47, %v755_v18 }
 0x1b1   : > { %v770_v59 = vsel %vm769_vm2, %v1087_v54, %v766_v17  ;;  %v611_v21 = vpack.c.bf16 %v609_v19, %v609_v19 }
 0x1b2   : > { %v772_v22 = vmul.f32 %v770_v59, %v1367_v3  ;;  %v695_v23 = vpack.c.bf16 %v693_v58, %v693_v58  ;;  %v760_v24 = vsel %vm759_vm4, %v1089_v47, %v756_v20 }
 0x1b3   : > { %614 = vst.msk [vmem:[%s1414_s30 + $0x4] sm:$0xf] %vm612_vm8, %v611_v21  ;;  %v771_v26 = vmul.f32 %v760_v24, %v1362_v63 }
 0x1b4   : > { %v774_v25 = vmul.f32 %v1392_v39, %v772_v22  ;;  %697 = vst.msk [vmem:[%s1421_s14 + $0x4] sm:$0xf] %vm612_vm8, %v695_v23 }
 0x1b5   : > { %v773_v28 = vmul.f32 %v1392_v39, %v771_v26 }
 0x1b6   : > { %v776_v27 = vadd.f32 %v1399_v44, %v774_v25 }
 0x1b7   : > { %v775_v29 = vadd.f32 %v1399_v44, %v773_v28 }
 0x1b8   : > { %v778_v3 = vpack.c.bf16 %v776_v27, %v776_v27 }
 0x1b9   : > { %v777_v30 = vpack.c.bf16 %v775_v29, %v775_v29 }
 0x1ba   : > { %780 = vst.msk [vmem:[%s505_s20 + $0x4] sm:$0xf] %vm612_vm8, %v778_v3 }
 0x1bb   : > { %779 = vst.msk [vmem:[%s505_s20] sm:$0xf] %vm612_vm8, %v777_v30 }
 0x1bc PF: > { %s24_s19 = sadd.s32 1, %s1180_s19   ;;  %s1476_s17 = smov %s1176_s18 }
 0x1bd   : > { %p21_p8 = scmp.ge.s32.totalorder %s24_s19, 4   ;;  %s1477_s18 = smov %s1479_s21 }
 0x1bf   :  { %23 = sbr.rel (!%p21_p8) target bundleno = 3 (0x3), region = 119 }
 0x1c4   :  { %861 = vsyncpa [#allocation3], 1 }
 0x1c5   :  { %863 = vsyncpa [#allocation3 + $0x1], 1 }
 0x1c6   :  { %864 = vsyncpa [#allocation5], 1 }

</bundles_post_ra>
